<compile_context>
chip_gen: v7x
topology: tpu7x:2x2x1
jax: 0.10.0
libtpu: 0.0.40
codegen_flags: <defaults>
</compile_context>

<pallas_src>
import functools

import jax
import jax.numpy as jnp
from jax.experimental import pallas as pl
from jax.experimental.pallas import tpu as pltpu


def _dice_partial_kernel(x_ref, t_ref, inter_ref, denom_ref, *, dhw, chunk):
    """Accumulates per-channel sum(x*t) and sum(x*x + t*t) over chunks of the
    flattened spatial axis. Outputs are per-batch-element partial sums."""
    i = pl.program_id(1)  # chunk index (reduction axis)

    @pl.when(i == 0)
    def _():
        inter_ref[...] = jnp.zeros_like(inter_ref)
        denom_ref[...] = jnp.zeros_like(denom_ref)

    x = x_ref[...].astype(jnp.float32)  # (C, chunk)
    t = t_ref[...].astype(jnp.float32)

    if dhw % chunk:
        # Ragged last chunk: Pallas does no bounds check on the trailing block,
        # so mask out-of-range lanes before they reach the accumulators.
        lane = jax.lax.broadcasted_iota(jnp.int32, x.shape, dimension=1)
        valid = (i * chunk + lane) < dhw
        x = jnp.where(valid, x, 0.0)
        t = jnp.where(valid, t, 0.0)

    inter_ref[...] += jnp.sum(x * t, axis=-1, keepdims=True)
    denom_ref[...] += jnp.sum(x * x + t * t, axis=-1, keepdims=True)


def _pick_chunk(C, itemsize, dhw, budget_bytes):
    """Largest lane-aligned chunk s.t. 2 inputs x 2 pipeline buffers (with the
    C axis sublane-padded to 8) fit within `budget_bytes` of VMEM."""
    sub_c = ((C + 7) // 8) * 8
    chunk = budget_bytes // (4 * sub_c * itemsize)
    chunk = max(128, (chunk // 128) * 128)
    dhw_padded = ((dhw + 127) // 128) * 128
    return min(chunk, dhw_padded)


@functools.partial(jax.jit, static_argnames=("vmem_buffer_budget",))
def dice3d_loss(inp, target, weight=None, *, vmem_buffer_budget=16 * 1024 * 1024):
    """Pallas equivalent of Dice3DLoss.forward.

    Args:
      inp:    (N, C, D, H, W) float array (assumed normalized probabilities).
      target: (N, C, D, H, W) float array.
      weight: optional (C,) per-channel weights (None -> unweighted).
      vmem_buffer_budget: VMEM bytes allotted to the pipelined input buffers.

    Returns:
      (loss_scalar, per_channel_dice[C])
    """
    N, C = inp.shape[0], inp.shape[1]
    dhw = 1
    for s in inp.shape[2:]:
        dhw *= s

    # Pure reshapes: NCDHW is contiguous in (N, C, DHW), no HBM copy.
    x = inp.reshape(N, C, dhw)
    t = target.reshape(N, C, dhw)

    itemsize = max(jnp.dtype(x.dtype).itemsize, jnp.dtype(t.dtype).itemsize)
    chunk = _pick_chunk(C, itemsize, dhw, vmem_buffer_budget)
    n_chunks = pl.cdiv(dhw, chunk)

    kernel = functools.partial(_dice_partial_kernel, dhw=dhw, chunk=chunk)

    partial_inter, partial_denom = pl.pallas_call(
        kernel,
        out_shape=(
            jax.ShapeDtypeStruct((N, C, 1), jnp.float32),
            jax.ShapeDtypeStruct((N, C, 1), jnp.float32),
        ),
        grid_spec=pltpu.PrefetchScalarGridSpec(
            num_scalar_prefetch=0,
            grid=(N, n_chunks),
            in_specs=[
                pl.BlockSpec((None, C, chunk), lambda n, i: (n, 0, i)),  # input
                pl.BlockSpec((None, C, chunk), lambda n, i: (n, 0, i)),  # target
            ],
            out_specs=[
                pl.BlockSpec((None, C, 1), lambda n, i: (n, 0, 0)),  # sum(x*t)
                pl.BlockSpec((None, C, 1), lambda n, i: (n, 0, 0)),  # sum(x*x+t*t)
            ],
        ),
        compiler_params=pltpu.CompilerParams(
            dimension_semantics=("parallel", "arbitrary"),
            vmem_limit_bytes=48 * 1024 * 1024,
        ),
    )(x, t)

    # Tiny O(N*C) finalize in plain JAX (matches the torch reference:
    # weight on the numerator only, eps added after weighting).
    intersect = jnp.sum(partial_inter[..., 0], axis=0)      # (C,)
    denominator = jnp.sum(partial_denom[..., 0], axis=0)    # (C,)
    if weight is not None:
        intersect = jnp.asarray(weight, jnp.float32).reshape(-1) * intersect
    eps = jnp.float32(1e-6)
    dice = 2.0 * (intersect + eps) / (denominator + eps)
    loss = 1.0 - jnp.mean(dice)
    return loss, dice


def _reference(inp, target, weight=None, epsilon=1e-6):
    C = inp.shape[1]
    x = jnp.moveaxis(inp, 1, 0).reshape(C, -1).astype(jnp.float32)
    t = jnp.moveaxis(target, 1, 0).reshape(C, -1).astype(jnp.float32)
    intersect = jnp.sum(x * t, axis=-1)
    if weight is not None:
        intersect = jnp.asarray(weight, jnp.float32) * intersect
    denom = jnp.sum(x * x, axis=-1) + jnp.sum(t * t, axis=-1)
    dice = 2.0 * (intersect + epsilon) / (denom + epsilon)
    return 1.0 - jnp.mean(dice), dice


if __name__ == "__main__":
    key = jax.random.PRNGKey(0)
    k1, k2 = jax.random.split(key)

    # Case 1: module-default usage (weight=None), chunk == full spatial extent.
    N, C, D, H, W = 2, 4, 16, 16, 16
    inp = jax.nn.sigmoid(jax.random.normal(k1, (N, C, D, H, W), jnp.float32))
    target = (jax.random.uniform(k2, (N, C, D, H, W)) > 0.5).astype(jnp.float32)

    loss, per_channel_dice = dice3d_loss(inp, target)
    jax.block_until_ready((loss, per_channel_dice))

    ref_loss, ref_dice = _reference(inp, target)
    assert jnp.allclose(loss, ref_loss, atol=1e-5, rtol=1e-5)
    assert jnp.allclose(per_channel_dice, ref_dice, atol=1e-5, rtol=1e-5)

    # Case 2: per-class weights + multi-chunk grid with a ragged last chunk
    # (small VMEM budget forces chunk=128 over dhw=315 -> in-kernel masking).
    N2, C2, D2, H2, W2 = 1, 4, 5, 7, 9
    inp2 = jax.nn.sigmoid(jax.random.normal(k2, (N2, C2, D2, H2, W2), jnp.float32))
    tgt2 = (jax.random.uniform(k1, (N2, C2, D2, H2, W2)) > 0.5).astype(jnp.float32)
    w2 = jnp.array([0.5, 1.0, 2.0, 1.5], jnp.float32)

    loss2, dice2 = dice3d_loss(inp2, tgt2, w2, vmem_buffer_budget=16 * 1024)
    jax.block_until_ready((loss2, dice2))

    ref_loss2, ref_dice2 = _reference(inp2, tgt2, w2)
    assert jnp.allclose(loss2, ref_loss2, atol=1e-5, rtol=1e-5)
    assert jnp.allclose(dice2, ref_dice2, atol=1e-5, rtol=1e-5)

    print("KERNEL_OK")
</pallas_src>

<mosaic_0001>
module attributes {stable_mosaic.version = 11 : i64} {
  func.func @_dice_partial_kernel(%arg0: i32, %arg1: i32, %arg2: memref<1x4x4096xf32, #tpu.memory_space<vmem>>, %arg3: memref<1x4x4096xf32, #tpu.memory_space<vmem>>, %arg4: memref<1x4x1xf32, #tpu.memory_space<vmem>>, %arg5: memref<1x4x1xf32, #tpu.memory_space<vmem>>) attributes {dimension_semantics = [#tpu.dimension_semantics<parallel>, #tpu.dimension_semantics<arbitrary>], iteration_bounds = array<i64: 2, 1>, scalar_prefetch = 0 : i64, scratch_operands = 0 : i64, tpu.core_type = #tpu.core_type<tc>, window_params = [{transform_indices = @transform_0, window_bounds = array<i64: 1, 4, 4096>}, {transform_indices = @transform_1, window_bounds = array<i64: 1, 4, 4096>}, {transform_indices = @transform_2, window_bounds = array<i64: 1, 4, 1>}, {transform_indices = @transform_3, window_bounds = array<i64: 1, 4, 1>}]} {
    %c0_i32 = arith.constant 0 : i32
    %0 = arith.cmpi eq, %arg1, %c0_i32 : i32
    %1 = arith.extui %0 : i1 to i32
    %c0_i32_0 = arith.constant 0 : i32
    %2 = arith.cmpi ne, %1, %c0_i32_0 : i32
    scf.if %2 {
      %cst_19 = arith.constant 0.000000e+00 : f32
      %27 = vector.broadcast %cst_19 : f32 to vector<4x1xf32>
      %c0_20 = arith.constant 0 : index
      %c0_21 = arith.constant 0 : index
      %c0_22 = arith.constant 0 : index
      %28 = vector.load %arg4[%c0_20, %c0_21, %c0_22] : memref<1x4x1xf32, #tpu.memory_space<vmem>>, vector<1x4x1xf32>
      %29 = vector.shape_cast %28 : vector<1x4x1xf32> to vector<4x1xf32>
      %30 = vector.shape_cast %27 : vector<4x1xf32> to vector<1x4x1xf32>
      tpu.vector_store %arg4[%c0_20, %c0_21, %c0_22], %30 {strides = array<i32>} : memref<1x4x1xf32, #tpu.memory_space<vmem>>, vector<1x4x1xf32>,
      %cst_23 = arith.constant 0.000000e+00 : f32
      %31 = vector.broadcast %cst_23 : f32 to vector<4x1xf32>
      %c0_24 = arith.constant 0 : index
      %c0_25 = arith.constant 0 : index
      %c0_26 = arith.constant 0 : index
      %32 = vector.load %arg5[%c0_24, %c0_25, %c0_26] : memref<1x4x1xf32, #tpu.memory_space<vmem>>, vector<1x4x1xf32>
      %33 = vector.shape_cast %32 : vector<1x4x1xf32> to vector<4x1xf32>
      %34 = vector.shape_cast %31 : vector<4x1xf32> to vector<1x4x1xf32>
      tpu.vector_store %arg5[%c0_24, %c0_25, %c0_26], %34 {strides = array<i32>} : memref<1x4x1xf32, #tpu.memory_space<vmem>>, vector<1x4x1xf32>,
    } else {
    }
    %c0 = arith.constant 0 : index
    %c0_1 = arith.constant 0 : index
    %c0_2 = arith.constant 0 : index
    %3 = vector.load %arg2[%c0, %c0_1, %c0_2] : memref<1x4x4096xf32, #tpu.memory_space<vmem>>, vector<1x4x4096xf32>
    %4 = vector.shape_cast %3 : vector<1x4x4096xf32> to vector<4x4096xf32>
    %c0_3 = arith.constant 0 : index
    %c0_4 = arith.constant 0 : index
    %c0_5 = arith.constant 0 : index
    %5 = vector.load %arg3[%c0_3, %c0_4, %c0_5] : memref<1x4x4096xf32, #tpu.memory_space<vmem>>, vector<1x4x4096xf32>
    %6 = vector.shape_cast %5 : vector<1x4x4096xf32> to vector<4x4096xf32>
    %c0_6 = arith.constant 0 : index
    %c0_7 = arith.constant 0 : index
    %c0_8 = arith.constant 0 : index
    %7 = vector.load %arg4[%c0_6, %c0_7, %c0_8] : memref<1x4x1xf32, #tpu.memory_space<vmem>>, vector<1x4x1xf32>
    %8 = vector.shape_cast %7 : vector<1x4x1xf32> to vector<4x1xf32>
    %9 = arith.mulf %4, %6 : vector<4x4096xf32>
    %cst = arith.constant dense<0.000000e+00> : vector<4xf32>
    %10 = vector.multi_reduction <add>, %9, %cst [1] : vector<4x4096xf32> to vector<4xf32>
    %11 = vector.shape_cast %10 : vector<4xf32> to vector<4x1xf32>
    %12 = arith.addf %8, %11 : vector<4x1xf32>
    %c0_9 = arith.constant 0 : index
    %c0_10 = arith.constant 0 : index
    %c0_11 = arith.constant 0 : index
    %13 = vector.load %arg4[%c0_9, %c0_10, %c0_11] : memref<1x4x1xf32, #tpu.memory_space<vmem>>, vector<1x4x1xf32>
    %14 = vector.shape_cast %13 : vector<1x4x1xf32> to vector<4x1xf32>
    %15 = vector.shape_cast %12 : vector<4x1xf32> to vector<1x4x1xf32>
    tpu.vector_store %arg4[%c0_9, %c0_10, %c0_11], %15 {strides = array<i32>} : memref<1x4x1xf32, #tpu.memory_space<vmem>>, vector<1x4x1xf32>,
    %c0_12 = arith.constant 0 : index
    %c0_13 = arith.constant 0 : index
    %c0_14 = arith.constant 0 : index
    %16 = vector.load %arg5[%c0_12, %c0_13, %c0_14] : memref<1x4x1xf32, #tpu.memory_space<vmem>>, vector<1x4x1xf32>
    %17 = vector.shape_cast %16 : vector<1x4x1xf32> to vector<4x1xf32>
    %18 = arith.mulf %4, %4 : vector<4x4096xf32>
    %19 = arith.mulf %6, %6 : vector<4x4096xf32>
    %20 = arith.addf %18, %19 : vector<4x4096xf32>
    %cst_15 = arith.constant dense<0.000000e+00> : vector<4xf32>
    %21 = vector.multi_reduction <add>, %20, %cst_15 [1] : vector<4x4096xf32> to vector<4xf32>
    %22 = vector.shape_cast %21 : vector<4xf32> to vector<4x1xf32>
    %23 = arith.addf %17, %22 : vector<4x1xf32>
    %c0_16 = arith.constant 0 : index
    %c0_17 = arith.constant 0 : index
    %c0_18 = arith.constant 0 : index
    %24 = vector.load %arg5[%c0_16, %c0_17, %c0_18] : memref<1x4x1xf32, #tpu.memory_space<vmem>>, vector<1x4x1xf32>
    %25 = vector.shape_cast %24 : vector<1x4x1xf32> to vector<4x1xf32>
    %26 = vector.shape_cast %23 : vector<4x1xf32> to vector<1x4x1xf32>
    tpu.vector_store %arg5[%c0_16, %c0_17, %c0_18], %26 {strides = array<i32>} : memref<1x4x1xf32, #tpu.memory_space<vmem>>, vector<1x4x1xf32>,
    return
  }
  func.func @transform_0(%arg0: i32, %arg1: i32) -> (i32, i32, i32) {
    %c0_i32 = arith.constant 0 : i32
    %c0_i32_0 = arith.constant 0 : i32
    return %arg0, %c0_i32, %arg1 : i32, i32, i32
  }
  func.func @transform_1(%arg0: i32, %arg1: i32) -> (i32, i32, i32) {
    %c0_i32 = arith.constant 0 : i32
    %c0_i32_0 = arith.constant 0 : i32
    return %arg0, %c0_i32, %arg1 : i32, i32, i32
  }
  func.func @transform_2(%arg0: i32, %arg1: i32) -> (i32, i32, i32) {
    %c0_i32 = arith.constant 0 : i32
    %c0_i32_0 = arith.constant 0 : i32
    %c0_i32_1 = arith.constant 0 : i32
    return %arg0, %c0_i32, %c0_i32_0 : i32, i32, i32
  }
  func.func @transform_3(%arg0: i32, %arg1: i32) -> (i32, i32, i32) {
    %c0_i32 = arith.constant 0 : i32
    %c0_i32_0 = arith.constant 0 : i32
    %c0_i32_1 = arith.constant 0 : i32
    return %arg0, %c0_i32, %c0_i32_0 : i32, i32, i32
  }
}

</mosaic_0001>

<bundles_post_ra>
// kernel: dice3d_loss.1
= control target key start
LH: loop header
LB: loop body
LE: loop exit
PB: predicated region body
PF: predicated region fallthrough
CT: control target
= control target key end

     0   :  { %s782_s12 = smov 0   ;;  %s784_s13 = smov 0   ;;  %s1025_s0 = inlined_call_operand.vmem [shape: f32[2,4,4096], index: 0, kind: input, shape index: {}]   ;;  %s1026_s1 = inlined_call_operand.vmem [shape: f32[2,4,4096], index: 1, kind: input, shape index: {}]   ;;  %s1027_s2 = inlined_call_operand.vmem [shape: f32[2,4,1], index: 2, kind: output, shape index: {0}]   ;;  %s1028_s3 = inlined_call_operand.vmem [shape: f32[2,4,1], index: 3, kind: output, shape index: {1}]  }
   0x1   :  { %s786_s14 = smov 0  }
   0x2 LB: > { %s26_s15 = sadd.s32 1, %s755_s13  ;;  %p701_p0 = scmp.ge.s32.totalorder %s759_s14, 1  ;;  %s759_s14 = sphi %s786_s14, %s14_s14   ;;  %s755_s13 = sphi %s784_s13, %s1030_s13   ;;  %s751_s12 = sphi %s782_s12, %s1029_s12  }
   0x3   : > { %p28_p1 = scmp.ge.s32.totalorder %s26_s15, 2  ;;  %p176_p2 = scmp.lt.s32.totalorder %s759_s14, 3 }
   0x5   : > { %s1032_s15 = smov (%p28_p1, %s26_s15), 0  ;;  %p177_p3 = pnand %p701_p0, %p176_p2 }
   0x6   : > { %p217_p4 = scmp.lt.s32.totalorder (!%p177_p3), %s751_s12, 1  ;;  %vm348_vm0 = vcmask (!%p177_p3), 1043456   ;;  %vm248_vm1 = vcmask (!%p177_p3), 3072  }
   0x7   : > { %180 = sbr.rel (%p177_p3) target bundleno = 241 (0xf1), region = 28 }
   0xe   : > { %s1034_s12 = smov (!%p217_p4, %s751_s12), 1 }
   0xf   : > { %s710_s16 = sshll.u32 %s1034_s12, 7  ;;  %s706_s23 = sshll.u32 %s1034_s12, 2 }
  0x10   : > { %s806_s19 = scalar_lea.vmem %s1025_s0, %s710_s16  ;;  %s811_s22 = scalar_lea.vmem %s1026_s1, %s710_s16 }
  0x11   : > { %v251_v0 = vld [vmem:[%s806_s19] sm:$0xff]  ;;  %v252_v2 = vld [vmem:[%s806_s19 + $0x8] sm:$0xff]  ;;  %v253_v6 = vld [vmem:[%s806_s19 + $0x10] sm:$0xff]  ;;  %s239_s26 = scalar_lea.vmem %s1027_s2, %s706_s23  ;;  %s243_s29 = scalar_lea.vmem %s1028_s3, %s706_s23 }
  0x12   : > { %v267_v1 = vld [vmem:[%s811_s22] sm:$0xff]  ;;  %v268_v3 = vld [vmem:[%s811_s22 + $0x8] sm:$0xff]  ;;  %v269_v7 = vld [vmem:[%s811_s22 + $0x10] sm:$0xff]  ;;  %v418_v33 = vmul.f32 %v251_v0, %v251_v0  ;;  %v419_v42 = vmul.f32 %v252_v2, %v252_v2  ;;  %v420_v53 = vmul.f32 %v253_v6, %v253_v6 }
  0x13   : > { %v284_v4 = vmul.f32 %v267_v1, %v251_v0  ;;  %v285_v5 = vmul.f32 %v268_v3, %v252_v2  ;;  %v286_v9 = vmul.f32 %v269_v7, %v253_v6  ;;  %v254_v11 = vld [vmem:[%s806_s19 + $0x18] sm:$0xff]  ;;  %v255_v20 = vld [vmem:[%s806_s19 + $0x20] sm:$0xff]  ;;  %v830_v28 = vld [vmem:[%s806_s19 + $0x28] sm:$0xff]  ;;  %v434_v37 = vmul.f32 %v267_v1, %v267_v1 }
  0x14   : > { %v270_v12 = vld [vmem:[%s811_s22 + $0x18] sm:$0xff]  ;;  %v271_v21 = vld [vmem:[%s811_s22 + $0x20] sm:$0xff]  ;;  %v833_v29 = vld [vmem:[%s811_s22 + $0x28] sm:$0xff]  ;;  %v435_v43 = vmul.f32 %v268_v3, %v268_v3  ;;  %v436_v54 = vmul.f32 %v269_v7, %v269_v7  ;;  %v421_v0 = vmul.f32 %v254_v11, %v254_v11 }
  0x15   : > { %v316_v8 = vcombine.high %v284_v4, %v284_v4  ;;  %v317_v10 = vcombine.high %v285_v5, %v285_v5  ;;  %v349_v13 = vsel %vm348_vm0, %v284_v4, 0.0  ;;  %v352_v15 = vsel %vm348_vm0, %v285_v5, 0.0  ;;  %v840_v38 = vld [vmem:[%s806_s19 + $0x30] sm:$0xff]  ;;  %v847_v45 = vld [vmem:[%s806_s19 + $0x38] sm:$0xff]  ;;  %v859_v58 = vld [vmem:[%s806_s19 + $0x40] sm:$0xff] }
  0x16   : > { %v287_v17 = vmul.f32 %v270_v12, %v254_v11  ;;  %v318_v18 = vcombine.high %v286_v9, %v286_v9  ;;  %v356_v23 = vsel %vm348_vm0, %v286_v9, 0.0  ;;  %v288_v25 = vmul.f32 %v271_v21, %v255_v20  ;;  %v843_v39 = vld [vmem:[%s811_s22 + $0x30] sm:$0xff]  ;;  %v850_v46 = vld [vmem:[%s811_s22 + $0x38] sm:$0xff]  ;;  %v862_v59 = vld [vmem:[%s811_s22 + $0x40] sm:$0xff] }
  0x17   : > { %v350_v14 = vsel %vm348_vm0, %v316_v8, 0.0  ;;  %v354_v19 = vsel %vm348_vm0, %v317_v10, 0.0  ;;  %v289_v34 = vmul.f32 %v833_v29, %v830_v28  ;;  %v290_v47 = vmul.f32 %v843_v39, %v840_v38  ;;  %v876_v11 = vld [vmem:[%s811_s22 + $0x48] sm:$0xff] }
  0x18   : > { %v351_v16 = vadd.f32 %v350_v14, %v349_v13  ;;  %v319_v26 = vcombine.high %v287_v17, %v287_v17  ;;  %v358_v27 = vsel %vm348_vm0, %v318_v18, 0.0  ;;  %v360_v31 = vsel %vm348_vm0, %v287_v17, 0.0  ;;  %v873_v14 = vld [vmem:[%s806_s19 + $0x48] sm:$0xff] }
  0x19   : > { %v320_v35 = vcombine.high %v288_v25, %v288_v25  ;;  %v364_v41 = vsel %vm348_vm0, %v288_v25, 0.0  ;;  %v321_v48 = vcombine.high %v289_v34, %v289_v34  ;;  %v450_v50 = vadd.f32 %v434_v37, %v418_v33 }
  0x1a   : > { %v353_v22 = vadd.f32 %v352_v15, %v351_v16  ;;  %v362_v36 = vsel %vm348_vm0, %v319_v26, 0.0  ;;  %v368_v52 = vsel %vm348_vm0, %v289_v34, 0.0  ;;  %v451_v55 = vadd.f32 %v435_v43, %v419_v42 }
  0x1b   : > { %v366_v49 = vsel %vm348_vm0, %v320_v35, 0.0  ;;  %v291_v56 = vmul.f32 %v850_v46, %v847_v45  ;;  %v322_v60 = vcombine.high %v290_v47, %v290_v47  ;;  %v370_v61 = vsel %vm348_vm0, %v321_v48, 0.0 }
  0x1c   : > { %v355_v24 = vadd.f32 %v354_v19, %v353_v22  ;;  %v482_v62 = vcombine.high %v450_v50, %v450_v50  ;;  %v372_v1 = vsel %vm348_vm0, %v290_v47, 0.0  ;;  %v437_v2 = vmul.f32 %v270_v12, %v270_v12 }
  0x1d   : > { %v452_v3 = vadd.f32 %v436_v54, %v420_v53  ;;  %v483_v4 = vcombine.high %v451_v55, %v451_v55  ;;  %v292_v5 = vmul.f32 %v862_v59, %v859_v58  ;;  %v323_v6 = vcombine.high %v291_v56, %v291_v56 }
  0x1e   : > { %v357_v30 = vadd.f32 %v356_v23, %v355_v24  ;;  %v374_v8 = vsel %vm348_vm0, %v322_v60, 0.0  ;;  %v514_v9 = vsel %vm348_vm0, %v450_v50, 0.0  ;;  %v515_v10 = vsel %vm348_vm0, %v482_v62, 0.0  ;;  %v901_v50 = vld [vmem:[%s806_s19 + $0x58] sm:$0xff] }
  0x1f   : > { %v517_v13 = vsel %vm348_vm0, %v451_v55, 0.0  ;;  %v376_v15 = vsel %vm348_vm0, %v291_v56, 0.0  ;;  %v422_v16 = vmul.f32 %v255_v20, %v255_v20  ;;  %v516_v17 = vadd.f32 %v515_v10, %v514_v9  ;;  %v888_v20 = vld [vmem:[%s811_s22 + $0x50] sm:$0xff] }
  0x20   : > { %v359_v32 = vadd.f32 %v358_v27, %v357_v30  ;;  %v438_v18 = vmul.f32 %v271_v21, %v271_v21  ;;  %v453_v19 = vadd.f32 %v437_v2, %v421_v0  ;;  %v484_v22 = vcombine.high %v452_v3, %v452_v3  ;;  %v917_v2 = vld [vmem:[%s806_s19 + $0x60] sm:$0xff] }
  0x21   : > { %v519_v23 = vsel %vm348_vm0, %v483_v4, 0.0  ;;  %v518_v25 = vadd.f32 %v517_v13, %v516_v17  ;;  %v293_v26 = vmul.f32 %v876_v11, %v873_v14  ;;  %v324_v27 = vcombine.high %v292_v5, %v292_v5 }
  0x22   : > { %v361_v40 = vadd.f32 %v360_v31, %v359_v32  ;;  %v378_v30 = vsel %vm348_vm0, %v323_v6, 0.0  ;;  %v521_v31 = vsel %vm348_vm0, %v452_v3, 0.0  ;;  %v885_v32 = vld [vmem:[%s806_s19 + $0x50] sm:$0xff]  ;;  %v380_v33 = vsel %vm348_vm0, %v292_v5, 0.0 }
  0x23   : > { %v423_v34 = vmul.f32 %v830_v28, %v830_v28  ;;  %v520_v35 = vadd.f32 %v519_v23, %v518_v25  ;;  %v454_v37 = vadd.f32 %v438_v18, %v422_v16  ;;  %v325_v47 = vcombine.high %v293_v26, %v293_v26  ;;  %v904_v28 = vld [vmem:[%s811_s22 + $0x58] sm:$0xff]  ;;  %v933_v18 = vld [vmem:[%s806_s19 + $0x68] sm:$0xff] }
  0x24   : > { %v363_v44 = vadd.f32 %v362_v36, %v361_v40  ;;  %v439_v36 = vmul.f32 %v833_v29, %v833_v29  ;;  %v485_v40 = vcombine.high %v453_v19, %v453_v19  ;;  %v382_v48 = vsel %vm348_vm0, %v324_v27, 0.0 }
  0x25   : > { %v522_v43 = vadd.f32 %v521_v31, %v520_v35  ;;  %v440_v54 = vmul.f32 %v843_v39, %v843_v39  ;;  %v486_v56 = vcombine.high %v454_v37, %v454_v37  ;;  %v295_v62 = vmul.f32 %v904_v28, %v901_v50 }
  0x26   : > { %v365_v51 = vadd.f32 %v364_v41, %v363_v44  ;;  %v523_v41 = vsel %vm348_vm0, %v484_v22, 0.0  ;;  %v294_v44 = vmul.f32 %v888_v20, %v885_v32  ;;  %v455_v55 = vadd.f32 %v439_v36, %v423_v34  ;;  %v949_v36 = vld [vmem:[%s806_s19 + $0x70] sm:$0xff] }
  0x27   : > { %v524_v53 = vadd.f32 %v523_v41, %v522_v43  ;;  %v386_v0 = vsel %vm348_vm0, %v325_v47, 0.0  ;;  %v425_v4 = vmul.f32 %v847_v45, %v847_v45  ;;  %v441_v6 = vmul.f32 %v850_v46, %v850_v46  ;;  %v936_v45 = vld [vmem:[%s811_s22 + $0x68] sm:$0xff] }
  0x28   : > { %v367_v57 = vadd.f32 %v366_v49, %v365_v51  ;;  %v525_v49 = vsel %vm348_vm0, %v453_v19, 0.0  ;;  %v384_v51 = vsel %vm348_vm0, %v293_v26, 0.0  ;;  %v388_v3 = vsel %vm348_vm0, %v294_v44, 0.0 }
  0x29   : > { %v531_v9 = vsel %vm348_vm0, %v486_v56, 0.0  ;;  %v533_v17 = vsel %vm348_vm0, %v455_v55, 0.0  ;;  %v392_v19 = vsel %vm348_vm0, %v295_v62, 0.0  ;;  %v426_v22 = vmul.f32 %v859_v58, %v859_v58  ;;  %v952_v58 = vld [vmem:[%s811_s22 + $0x70] sm:$0xff] }
  0x2a   : > { %v369_v63 = vadd.f32 %v368_v52, %v367_v57  ;;  %v424_v52 = vmul.f32 %v840_v38, %v840_v38  ;;  %v527_v57 = vsel %vm348_vm0, %v485_v40, 0.0  ;;  %v920_v38 = vld [vmem:[%s811_s22 + $0x60] sm:$0xff]  ;;  %v457_v25 = vadd.f32 %v441_v6, %v425_v4 }
  0x2b   : > { %v427_v40 = vmul.f32 %v873_v14, %v873_v14  ;;  %v282_v14 = vld [vmem:[%s811_s22 + $0x78] sm:$0xff] }
  0x2c   : > { %v371_v7 = vadd.f32 %v370_v61, %v369_v63  ;;  %v526_v61 = vadd.f32 %v525_v49, %v524_v53  ;;  %v326_v63 = vcombine.high %v294_v44, %v294_v44  ;;  %v489_v44 = vcombine.high %v457_v25, %v457_v25 }
  0x2d   : > { %v541_v53 = vsel %vm348_vm0, %v457_v25, 0.0 }
  0x2e   : > { %v373_v12 = vadd.f32 %v372_v1, %v371_v7  ;;  %v529_v1 = vsel %vm348_vm0, %v454_v37, 0.0  ;;  %v528_v5 = vadd.f32 %v527_v57, %v526_v61  ;;  %v456_v7 = vadd.f32 %v440_v54, %v424_v52  ;;  %v266_v54 = vld [vmem:[%s806_s19 + $0x78] sm:$0xff] }
  0x2f   : > { %v390_v16 = vsel %vm348_vm0, %v326_v63, 0.0  ;;  %v543_v63 = vsel %vm348_vm0, %v489_v44, 0.0 }
  0x30   : > { %v375_v24 = vadd.f32 %v374_v8, %v373_v12  ;;  %v487_v8 = vcombine.high %v455_v55, %v455_v55  ;;  %v530_v13 = vadd.f32 %v529_v1, %v528_v5  ;;  %v296_v12 = vmul.f32 %v920_v38, %v917_v2 }
  0x31   : > { %v488_v26 = vcombine.high %v456_v7, %v456_v7  ;;  %v537_v35 = vsel %vm348_vm0, %v456_v7, 0.0 }
  0x32   : > { %v377_v21 = vadd.f32 %v376_v15, %v375_v24  ;;  %v327_v15 = vcombine.high %v295_v62, %v295_v62  ;;  %v532_v23 = vadd.f32 %v531_v9, %v530_v13  ;;  %v442_v24 = vmul.f32 %v862_v59, %v862_v59 }
  0x33   : > { %v535_v27 = vsel %vm348_vm0, %v487_v8, 0.0  ;;  %v396_v37 = vsel %vm348_vm0, %v296_v12, 0.0  ;;  %v539_v47 = vsel %vm348_vm0, %v488_v26, 0.0 }
  0x34   : > { %v379_v42 = vadd.f32 %v378_v30, %v377_v21  ;;  %v534_v31 = vadd.f32 %v533_v17, %v532_v23  ;;  %v297_v21 = vmul.f32 %v936_v45, %v933_v18  ;;  %v394_v34 = vsel %vm348_vm0, %v327_v15, 0.0 }
  0x35   : > { %v458_v43 = vadd.f32 %v442_v24, %v426_v22 }
  0x36   : > { %v381_v29 = vadd.f32 %v380_v33, %v379_v42  ;;  %v328_v33 = vcombine.high %v296_v12, %v296_v12  ;;  %v536_v41 = vadd.f32 %v535_v27, %v534_v31  ;;  %v443_v42 = vmul.f32 %v876_v11, %v876_v11 }
  0x37   : > { %v400_v56 = vsel %vm348_vm0, %v297_v21, 0.0  ;;  %v428_v11 = vmul.f32 %v885_v32, %v885_v32  ;;  %v490_v62 = vcombine.high %v458_v43, %v458_v43  ;;  %v545_v5 = vsel %vm348_vm0, %v458_v43, 0.0 }
  0x38   : > { %v383_v60 = vadd.f32 %v382_v48, %v381_v29  ;;  %v538_v49 = vadd.f32 %v537_v35, %v536_v41  ;;  %v298_v29 = vmul.f32 %v952_v58, %v949_v36  ;;  %v398_v52 = vsel %vm348_vm0, %v328_v33, 0.0 }
  0x39   : > { %v459_v61 = vadd.f32 %v443_v42, %v427_v40  ;;  %v429_v32 = vmul.f32 %v901_v50, %v901_v50  ;;  %v547_v13 = vsel %vm348_vm0, %v490_v62, 0.0  ;;  %v430_v50 = vmul.f32 %v917_v2, %v917_v2 }
  0x3a   : > { %v385_v39 = vadd.f32 %v384_v51, %v383_v60  ;;  %v329_v51 = vcombine.high %v297_v21, %v297_v21  ;;  %v540_v57 = vadd.f32 %v539_v47, %v538_v49  ;;  %v444_v60 = vmul.f32 %v888_v20, %v888_v20 }
  0x3b   : > { %v404_v7 = vsel %vm348_vm0, %v298_v29, 0.0  ;;  %v445_v20 = vmul.f32 %v904_v28, %v904_v28  ;;  %v446_v28 = vmul.f32 %v920_v38, %v920_v38  ;;  %v447_v2 = vmul.f32 %v936_v45, %v936_v45 }
  0x3c   : > { %v387_v10 = vadd.f32 %v386_v0, %v385_v39  ;;  %v542_v1 = vadd.f32 %v541_v53, %v540_v57  ;;  %v299_v39 = vmul.f32 %v282_v14, %v266_v54  ;;  %v402_v4 = vsel %vm348_vm0, %v329_v51, 0.0 }
  0x3d   : > { %v460_v9 = vadd.f32 %v444_v60, %v428_v11  ;;  %v461_v24 = vadd.f32 %v445_v20, %v429_v32  ;;  %v432_v43 = vmul.f32 %v949_v36, %v949_v36  ;;  %v433_v51 = vmul.f32 %v266_v54, %v266_v54 }
  0x3e   : > { %v389_v46 = vadd.f32 %v388_v3, %v387_v10  ;;  %v330_v3 = vcombine.high %v298_v29, %v298_v29  ;;  %v544_v8 = vadd.f32 %v543_v63, %v542_v1  ;;  %v491_v10 = vcombine.high %v459_v61, %v459_v61 }
  0x3f   : > { %v408_v22 = vsel %vm348_vm0, %v299_v39, 0.0  ;;  %v492_v25 = vcombine.high %v460_v9, %v460_v9  ;;  %v553_v21 = vsel %vm348_vm0, %v460_v9, 0.0  ;;  %v493_v38 = vcombine.high %v461_v24, %v461_v24 }
  0x40   : > { %v391_v30 = vadd.f32 %v390_v16, %v389_v46  ;;  %v546_v15 = vadd.f32 %v545_v5, %v544_v8  ;;  %v331_v16 = vcombine.high %v299_v39, %v299_v39  ;;  %v406_v17 = vsel %vm348_vm0, %v330_v3, 0.0 }
  0x41   : > { %v549_v46 = vsel %vm348_vm0, %v459_v61, 0.0  ;;  %v551_v26 = vsel %vm348_vm0, %v491_v10, 0.0  ;;  %v557_v42 = vsel %vm348_vm0, %v461_v24, 0.0  ;;  %v559_v45 = vsel %vm348_vm0, %v493_v38, 0.0 }
  0x42   : > { %v393_v59 = vadd.f32 %v392_v19, %v391_v30  ;;  %v548_v23 = vadd.f32 %v547_v13, %v546_v15  ;;  %v410_v31 = vsel %vm348_vm0, %v331_v16, 0.0  ;;  %v449_v53 = vmul.f32 %v282_v14, %v282_v14 }
  0x43   : > { %v761_v32 = vmov 0.0  }
  0x44   : > { %v395_v48 = vadd.f32 %v394_v34, %v393_v59  ;;  %v550_v30 = vadd.f32 %v549_v46, %v548_v23  ;;  %v431_v34 = vmul.f32 %v933_v18, %v933_v18  ;;  %v462_v59 = vadd.f32 %v446_v28, %v430_v50  ;;  %249 = vst.msk [vmem:[%s239_s26] sm:$0xf] %vm248_vm1, %v761_v32 }
  0x45   : > { %v448_v18 = vmul.f32 %v952_v58, %v952_v58  ;;  %v465_v58 = vadd.f32 %v449_v53, %v433_v51  ;;  %250 = vst.msk [vmem:[%s243_s29] sm:$0xf] %vm248_vm1, %v761_v32 }
  0x46   : > { %v397_v55 = vadd.f32 %v396_v37, %v395_v48  ;;  %v552_v35 = vadd.f32 %v551_v26, %v550_v30  ;;  %v555_v37 = vsel %vm348_vm0, %v492_v25, 0.0  ;;  %v463_v47 = vadd.f32 %v447_v2, %v431_v34 }
  0x47   : > { %v494_v48 = vcombine.high %v462_v59, %v462_v59  ;;  %v561_v29 = vsel %vm348_vm0, %v462_v59, 0.0  ;;  %v497_v54 = vcombine.high %v465_v58, %v465_v58  ;;  %v573_v3 = vsel %vm348_vm0, %v465_v58, 0.0 }
  0x48   : > { %v399_v0 = vadd.f32 %v398_v52, %v397_v55  ;;  %v554_v41 = vadd.f32 %v553_v21, %v552_v35  ;;  %v464_v55 = vadd.f32 %v448_v18, %v432_v43  ;;  %v565_v36 = vsel %vm348_vm0, %v463_v47, 0.0 }
  0x49   : > { %v563_v11 = vsel %vm348_vm0, %v494_v48, 0.0  ;;  %v575_v5 = vsel %vm348_vm0, %v497_v54, 0.0 }
  0x4a   : > { %v401_v6 = vadd.f32 %v400_v56, %v399_v0  ;;  %v556_v44 = vadd.f32 %v555_v37, %v554_v41  ;;  %v495_v56 = vcombine.high %v463_v47, %v463_v47  ;;  %v496_v61 = vcombine.high %v464_v55, %v464_v55 }
  0x4b   : > { %v569_v0 = vsel %vm348_vm0, %v464_v55, 0.0  ;;  %v283_v8 = vld [vmem:[%s239_s26] sm:$0xf] }
  0x4c   : > { %v403_v12 = vadd.f32 %v402_v4, %v401_v6  ;;  %v558_v49 = vadd.f32 %v557_v42, %v556_v44  ;;  %v567_v62 = vsel %vm348_vm0, %v495_v56, 0.0  ;;  %v571_v14 = vsel %vm348_vm0, %v496_v61, 0.0  ;;  %v417_v10 = vld [vmem:[%s243_s29] sm:$0xf] }
  0x4e   : > { %v405_v19 = vadd.f32 %v404_v7, %v403_v12  ;;  %v560_v52 = vadd.f32 %v559_v45, %v558_v49 }
  0x50   : > { %v407_v27 = vadd.f32 %v406_v17, %v405_v19  ;;  %v562_v57 = vadd.f32 %v561_v29, %v560_v52 }
  0x52   : > { %v409_v33 = vadd.f32 %v408_v22, %v407_v27  ;;  %v564_v60 = vadd.f32 %v563_v11, %v562_v57 }
  0x54   : > { %v411_v40 = vadd.f32 %v410_v31, %v409_v33  ;;  %v566_v63 = vadd.f32 %v565_v36, %v564_v60 }
  0x56   : > { %412 = vadd.xlane.f32.xlu0 %v411_v40  ;;  %v568_v1 = vadd.f32 %v567_v62, %v566_v63 }
  0x58   : > { %v570_v39 = vadd.f32 %v569_v0, %v568_v1 }
  0x5a   : > { %v572_v4 = vadd.f32 %v571_v14, %v570_v39 }
  0x5c   : > { %v574_v6 = vadd.f32 %v573_v3, %v572_v4 }
  0x5e   : > { %v576_v7 = vadd.f32 %v575_v5, %v574_v6 }
  0x60   : > { %577 = vadd.xlane.f32.xlu0 %v576_v7 }
  0xe3   : > { %v413_v20 = vpop.xlane.xlu0 %412 }
  0xe4   : > { %v414_v9 = vadd.f32 %v413_v20, %v283_v8 }
  0xe6   : > { %416 = vst.msk [vmem:[%s239_s26] sm:$0xf] %vm248_vm1, %v414_v9 }
  0xed   : > { %v578_v13 = vpop.xlane.xlu0 %577 }
  0xee   : > { %v579_v12 = vadd.f32 %v578_v13, %v417_v10 }
  0xf0   : > { %580 = vst.msk [vmem:[%s243_s29] sm:$0xf] %vm248_vm1, %v579_v12 }
  0xf1 PF: > { %s14_s14 = sadd.s32 1, %s759_s14   ;;  %s1029_s12 = smov %s755_s13 }
  0xf2   : > { %p11_p5 = scmp.ge.s32.totalorder %s14_s14, 4   ;;  %s1030_s13 = smov %s1032_s15 }
  0xf4   :  { %13 = sbr.rel (!%p11_p5) target bundleno = 2 (0x2), region = 77 }

</bundles_post_ra>
